<compile_context>
chip_gen: v7x
topology: tpu7x:2x2x1
jax: 0.10.0
libtpu: 0.0.40
codegen_flags: <defaults>
</compile_context>

<pallas_src>
import functools

import jax
import jax.numpy as jnp
from jax.experimental import pallas as pl
from jax.experimental.pallas import tpu as pltpu

EPS = 1e-5  # PyTorch GroupNorm default eps


def _round_up(x, m):
    return (x + m - 1) // m * m


def _point_reducer_kernel(x_ref, w_ref, gb_ref, o_ref, *, n_valid, eps):
    # x_ref : (bb, Kp, Lp)  per-sample K-major patches (mask row included, zero padded)
    # w_ref : (Ep, Kp)      projection weight with conv bias folded in as column K
    # gb_ref: (Ep, 2)       col 0 = GroupNorm gamma, col 1 = beta (zero in padded rows)
    # o_ref : (bb, Ep, Lp)
    bb = x_ref.shape[0]
    inv_n = 1.0 / n_valid
    w = w_ref[...]
    gamma = gb_ref[:, 0:1]            # (Ep, 1) f32
    beta = gb_ref[:, 1:2]             # (Ep, 1) f32
    for s in range(bb):               # static unroll; bb is small (VMEM-budgeted)
        # Conv-as-matmul on the MXU, f32 accumulation; bias rides via the mask row of x.
        y = jnp.dot(w, x_ref[s], preferred_element_type=jnp.float32)   # (Ep, Lp) f32
        # GroupNorm(1, E) per sample. Padded rows/cols of y are exactly 0 -> plain sums exact.
        mean = jnp.sum(y) * inv_n
        var = jnp.sum(y * y) * inv_n - mean * mean
        inv = jax.lax.rsqrt(var + eps)             # EUP slot
        scale = gamma * inv                        # (Ep, 1)
        shift = beta - mean * scale                # (Ep, 1)
        o_ref[s] = (y * scale + shift).astype(o_ref.dtype)   # single FMA per element


def point_reducer(x, conv_w, conv_b, gn_w, gn_b, *, patch_size, padding,
                  matmul_dtype=jnp.bfloat16):
    """x: (B, C_in, H, W) NCHW. Returns (B, E, Ho, Wo), matching the PyTorch module.

    matmul_dtype: dtype of the MXU operands (patches / weight). bf16 by default on all
    generations (the MXU is bf16-native everywhere; accumulation and GroupNorm math stay f32).
    Pass None / jnp.float32 for bit-tight f32 operands.
    """
    B, C_in, H, W = x.shape
    E = conv_w.shape[0]
    P = patch_size

    # --- glue: pad + extract non-overlapping patches (kernel_size == stride), K-major ---
    xp = jnp.pad(x, ((0, 0), (0, 0), (padding, padding), (padding, padding)))
    Hp, Wp = H + 2 * padding, W + 2 * padding
    Ho, Wo = Hp // P, Wp // P
    xp = xp[:, :, : Ho * P, : Wo * P]   # PyTorch conv drops trailing rows/cols
    # TODO(synk): this NCHW->patches transpose is still one XLA HBM round trip of the input;
    # a manual-DMA variant fetching (C, P, Wo*P) row strips per grid step would remove it.
    patches = (xp.reshape(B, C_in, Ho, P, Wo, P)
                 .transpose(0, 1, 3, 5, 2, 4)
                 .reshape(B, C_in * P * P, Ho * Wo))
    L, K = Ho * Wo, C_in * P * P

    # --- lane-dense padding; Ep to 256-multiples when E >= 256 (full MXU N side on v6e/v7x) ---
    Kp = _round_up(K + 1, 128)                      # +1: bias/mask row
    Ep = _round_up(E, 256) if E >= 256 else _round_up(E, 128)
    Lp = _round_up(L, 128)

    # mask row: 1 for real L columns, 0 elsewhere -> conv bias rides the matmul, padded rows stay 0
    mask_row = jnp.ones((B, 1, L), patches.dtype)
    patches = jnp.concatenate([patches, mask_row], axis=1)          # (B, K+1, L)
    patches = jnp.pad(patches, ((0, 0), (0, Kp - (K + 1)), (0, Lp - L)))

    w_mat = jnp.concatenate([conv_w.reshape(E, K), conv_b.reshape(E, 1)], axis=1)  # (E, K+1)
    w_mat = jnp.pad(w_mat, ((0, Ep - E), (0, Kp - (K + 1))))

    gb = jnp.stack([gn_w, gn_b], axis=1).astype(jnp.float32)        # (E, 2)
    gb = jnp.pad(gb, ((0, Ep - E), (0, 0)))                         # (Ep, 2)

    if matmul_dtype is not None:
        patches = patches.astype(matmul_dtype)
        w_mat = w_mat.astype(matmul_dtype)

    in_sz = jnp.dtype(patches.dtype).itemsize
    out_sz = jnp.dtype(x.dtype).itemsize

    # --- block sizing from per-generation VMEM (64 MiB on v7x, 128 MiB on v5e/v6e) ---
    try:
        vmem_cap = int(pltpu.get_tpu_info().vmem_capacity_bytes)
    except Exception:
        vmem_cap = 64 * 1024 * 1024
    budget = int(0.7 * vmem_cap)

    def vmem_need(bb):
        return (2 * bb * Kp * Lp * in_sz          # input block, double-buffered
                + 2 * bb * Ep * Lp * out_sz        # output block, double-buffered
                + 2 * Ep * Kp * in_sz              # resident weight
                + 2 * Ep * 128 * 4                 # gamma/beta operand (lane-padded)
                + 3 * Ep * Lp * 4)                 # f32 temporaries (y, y*y, normalized)

    # Keep >= min(B, 4) grid steps so per-TC DMA pipelining works (and both v7x TCs get
    # >= 2 steps when B allows); within that, pick the largest bb that fits the VMEM budget.
    bb_cap = max(1, B // min(B, 4))
    bb = 1
    for cand in range(min(B, bb_cap), 0, -1):
        if B % cand == 0 and vmem_need(cand) <= budget:
            bb = cand
            break
    grid = (B // bb,)
    # TODO(synk): add an L-tiled path (running sum/sumsq scratch + second normalize pass) for
    # L*Ep so large that even a single-sample block exceeds the VMEM budget.

    vmem_limit = int(max(32 * 1024 * 1024,
                         min(vmem_cap * 3 // 4, int(vmem_need(bb) * 1.5))))

    kernel = functools.partial(_point_reducer_kernel, n_valid=float(L * E), eps=EPS)

    cost = pl.CostEstimate(
        flops=2 * B * Ep * Lp * Kp,
        transcendentals=B,
        bytes_accessed=(B * Kp * Lp * in_sz + Ep * Kp * in_sz
                        + B * Ep * Lp * out_sz + Ep * 2 * 4),
    )

    out = pl.pallas_call(
        kernel,
        out_shape=jax.ShapeDtypeStruct((B, Ep, Lp), x.dtype),
        grid_spec=pltpu.PrefetchScalarGridSpec(
            num_scalar_prefetch=0,
            grid=grid,
            in_specs=[
                pl.BlockSpec((bb, Kp, Lp), lambda i: (i, 0, 0)),
                pl.BlockSpec((Ep, Kp), lambda i: (0, 0)),
                pl.BlockSpec((Ep, 2), lambda i: (0, 0)),
            ],
            out_specs=pl.BlockSpec((bb, Ep, Lp), lambda i: (i, 0, 0)),
        ),
        compiler_params=pltpu.CompilerParams(
            dimension_semantics=("parallel",),
            vmem_limit_bytes=vmem_limit),
        cost_estimate=cost,
    )(patches, w_mat, gb)

    # --- glue: slice off E/L padding; (B, E, L) -> (B, E, Ho, Wo) is a free reshape (no transpose) ---
    out = out[:, :E, :L]
    return out.reshape(B, E, Ho, Wo)


if __name__ == "__main__":
    # Small shapes consistent with the module's forward.
    B, C_in, H, W = 2, 4, 16, 16
    patch_size, padding, embed_dim = 4, 0, 32

    key = jax.random.PRNGKey(0)
    k_x, k_w, k_b, k_g, k_beta = jax.random.split(key, 5)

    x = jax.random.normal(k_x, (B, C_in, H, W), dtype=jnp.float32)
    conv_w = jax.random.normal(k_w, (embed_dim, C_in, patch_size, patch_size),
                               dtype=jnp.float32) * 0.05
    conv_b = jax.random.normal(k_b, (embed_dim,), dtype=jnp.float32) * 0.05
    gn_w = 1.0 + 0.1 * jax.random.normal(k_g, (embed_dim,), dtype=jnp.float32)
    gn_b = 0.1 * jax.random.normal(k_beta, (embed_dim,), dtype=jnp.float32)

    def reference(x_in, w_in):
        # Pure-JAX Conv2d + GroupNorm(1, E) reference with the same operand dtypes.
        y_conv = jax.lax.conv_general_dilated(
            x_in, w_in, window_strides=(patch_size, patch_size),
            padding=[(padding, padding), (padding, padding)],
            dimension_numbers=("NCHW", "OIHW", "NCHW"),
            preferred_element_type=jnp.float32)
        y_conv = y_conv + conv_b[None, :, None, None]
        mean = y_conv.mean(axis=(1, 2, 3), keepdims=True)
        var = ((y_conv - mean) ** 2).mean(axis=(1, 2, 3), keepdims=True)
        y = (y_conv - mean) * jax.lax.rsqrt(var + EPS)
        return y * gn_w[None, :, None, None] + gn_b[None, :, None, None]

    # f32-operand path: bit-tight check.
    y32 = point_reducer(x, conv_w, conv_b, gn_w, gn_b,
                        patch_size=patch_size, padding=padding, matmul_dtype=None)
    jax.block_until_ready(y32)
    ref32 = reference(x, conv_w)
    assert y32.shape == ref32.shape, (y32.shape, ref32.shape)
    assert jnp.allclose(y32, ref32, atol=1e-4, rtol=1e-4), float(jnp.abs(y32 - ref32).max())

    # Default bf16-operand path (production): check vs a bf16-operand reference.
    ybf = point_reducer(x, conv_w, conv_b, gn_w, gn_b,
                        patch_size=patch_size, padding=padding)
    jax.block_until_ready(ybf)
    refbf = reference(x.astype(jnp.bfloat16), conv_w.astype(jnp.bfloat16))
    assert ybf.shape == refbf.shape, (ybf.shape, refbf.shape)
    assert jnp.allclose(ybf, refbf, atol=1e-2, rtol=1e-2), float(jnp.abs(ybf - refbf).max())

    print("KERNEL_OK")
</pallas_src>

<mosaic_0001>
module attributes {stable_mosaic.version = 11 : i64} {
  func.func @_point_reducer_kernel(%arg0: i32, %arg1: memref<1x128x128xf32, #tpu.memory_space<vmem>>, %arg2: memref<128x128xf32, #tpu.memory_space<vmem>>, %arg3: memref<128x2xf32, #tpu.memory_space<vmem>>, %arg4: memref<1x128x128xf32, #tpu.memory_space<vmem>>) attributes {dimension_semantics = [#tpu.dimension_semantics<parallel>], iteration_bounds = array<i64: 2>, scalar_prefetch = 0 : i64, scratch_operands = 0 : i64, tpu.core_type = #tpu.core_type<tc>, window_params = [{transform_indices = @transform_0, window_bounds = array<i64: 1, 128, 128>}, {pipeline_mode = #tpu.pipeline_mode<synchronous>, transform_indices = @transform_1, window_bounds = array<i64: 128, 128>}, {pipeline_mode = #tpu.pipeline_mode<synchronous>, transform_indices = @transform_2, window_bounds = array<i64: 128, 2>}, {transform_indices = @transform_3, window_bounds = array<i64: 1, 128, 128>}]} {
    %c0 = arith.constant 0 : index
    %c0_0 = arith.constant 0 : index
    %0 = vector.load %arg2[%c0, %c0_0] : memref<128x128xf32, #tpu.memory_space<vmem>>, vector<128x128xf32>
    %c0_1 = arith.constant 0 : index
    %c0_2 = arith.constant 0 : index
    %1 = vector.load %arg3[%c0_1, %c0_2] : memref<128x2xf32, #tpu.memory_space<vmem>>, vector<128x1xf32>
    %c0_3 = arith.constant 0 : index
    %c1 = arith.constant 1 : index
    %2 = vector.load %arg3[%c0_3, %c1] : memref<128x2xf32, #tpu.memory_space<vmem>>, vector<128x1xf32>
    %c0_4 = arith.constant 0 : index
    %c0_5 = arith.constant 0 : index
    %c0_6 = arith.constant 0 : index
    %3 = vector.load %arg1[%c0_4, %c0_5, %c0_6] : memref<1x128x128xf32, #tpu.memory_space<vmem>>, vector<1x128x128xf32>
    %4 = vector.shape_cast %3 : vector<1x128x128xf32> to vector<128x128xf32>
    %cst = arith.constant dense<0.000000e+00> : vector<128x128xf32>
    %5 = tpu.matmul %0, %4, %cst {dimension_numbers = #tpu.dot_dimension_numbers<[1], [0], [0], [1], [0, 0, 1, 1], [], []>} : vector<128x128xf32>, vector<128x128xf32>, vector<128x128xf32> -> vector<128x128xf32>
    %6 = vector.shape_cast %5 : vector<128x128xf32> to vector<1x128x128xf32>
    %cst_7 = arith.constant dense<0.000000e+00> : vector<1xf32>
    %7 = vector.multi_reduction <add>, %6, %cst_7 [1, 2] : vector<1x128x128xf32> to vector<1xf32>
    %8 = vector.shape_cast %7 : vector<1xf32> to vector<1x1x1xf32>
    %9 = vector.extract %8[0, 0, 0] : f32 from vector<1x1x1xf32>
    %cst_8 = arith.constant 0.001953125 : f32
    %10 = arith.mulf %9, %cst_8 : f32
    %11 = arith.mulf %5, %5 : vector<128x128xf32>
    %12 = vector.shape_cast %11 : vector<128x128xf32> to vector<1x128x128xf32>
    %cst_9 = arith.constant dense<0.000000e+00> : vector<1xf32>
    %13 = vector.multi_reduction <add>, %12, %cst_9 [1, 2] : vector<1x128x128xf32> to vector<1xf32>
    %14 = vector.shape_cast %13 : vector<1xf32> to vector<1x1x1xf32>
    %15 = vector.extract %14[0, 0, 0] : f32 from vector<1x1x1xf32>
    %cst_10 = arith.constant 0.001953125 : f32
    %16 = arith.mulf %15, %cst_10 : f32
    %17 = arith.mulf %10, %10 : f32
    %18 = arith.subf %16, %17 : f32
    %cst_11 = arith.constant 9.99999974E-6 : f32
    %19 = arith.addf %18, %cst_11 : f32
    %20 = math.rsqrt %19 : f32
    %21 = vector.broadcast %20 : f32 to vector<128x1xf32>
    %22 = arith.mulf %1, %21 : vector<128x1xf32>
    %23 = vector.broadcast %10 : f32 to vector<128x1xf32>
    %24 = arith.mulf %23, %22 : vector<128x1xf32>
    %25 = arith.subf %2, %24 : vector<128x1xf32>
    %26 = vector.broadcast %22 : vector<128x1xf32> to vector<128x128xf32>
    %27 = arith.mulf %5, %26 : vector<128x128xf32>
    %28 = vector.broadcast %25 : vector<128x1xf32> to vector<128x128xf32>
    %29 = arith.addf %27, %28 : vector<128x128xf32>
    %c0_12 = arith.constant 0 : index
    %c0_13 = arith.constant 0 : index
    %c0_14 = arith.constant 0 : index
    %30 = vector.load %arg4[%c0_12, %c0_13, %c0_14] : memref<1x128x128xf32, #tpu.memory_space<vmem>>, vector<1x128x128xf32>
    %31 = vector.shape_cast %30 : vector<1x128x128xf32> to vector<128x128xf32>
    %32 = vector.shape_cast %29 : vector<128x128xf32> to vector<1x128x128xf32>
    tpu.vector_store %arg4[%c0_12, %c0_13, %c0_14], %32 {strides = array<i32>} : memref<1x128x128xf32, #tpu.memory_space<vmem>>, vector<1x128x128xf32>,
    return
  }
  func.func @transform_0(%arg0: i32) -> (i32, i32, i32) {
    %c0_i32 = arith.constant 0 : i32
    %c0_i32_0 = arith.constant 0 : i32
    %c0_i32_1 = arith.constant 0 : i32
    return %arg0, %c0_i32, %c0_i32_0 : i32, i32, i32
  }
  func.func @transform_1(%arg0: i32) -> (i32, i32) {
    %c0_i32 = arith.constant 0 : i32
    %c0_i32_0 = arith.constant 0 : i32
    %c0_i32_1 = arith.constant 0 : i32
    return %c0_i32, %c0_i32_0 : i32, i32
  }
  func.func @transform_2(%arg0: i32) -> (i32, i32) {
    %c0_i32 = arith.constant 0 : i32
    %c0_i32_0 = arith.constant 0 : i32
    %c0_i32_1 = arith.constant 0 : i32
    return %c0_i32, %c0_i32_0 : i32, i32
  }
  func.func @transform_3(%arg0: i32) -> (i32, i32, i32) {
    %c0_i32 = arith.constant 0 : i32
    %c0_i32_0 = arith.constant 0 : i32
    %c0_i32_1 = arith.constant 0 : i32
    return %arg0, %c0_i32, %c0_i32_0 : i32, i32, i32
  }
}

</mosaic_0001>

<bundles_post_ra>
// kernel: tpu_custom_call.1
= control target key start
LH: loop header
LB: loop body
LE: loop exit
PB: predicated region body
PF: predicated region fallthrough
CT: control target
= control target key end

     0   :  { %8 = vsyncpa [#allocation3], 0  ;;  %s1731_s0 = inlined_call_operand.hbm [shape: f32[2,128,128], index: 0, kind: input, shape index: {}]   ;;  %s1732_s1 = inlined_call_operand.vmem [shape: f32[128,128], index: 1, kind: input, shape index: {}]   ;;  %s1733_s2 = inlined_call_operand.vmem [shape: f32[128,2], index: 2, kind: input, shape index: {}]   ;;  %s1734_s3 = inlined_call_operand.hbm [shape: f32[2,128,128], index: 3, kind: output, shape index: {}]  }
   0x1   :  { %10 = vsyncpa [#allocation3 + $0x1], 0 }
   0x2   :  { %11 = vsyncpa [#allocation4], 0 }
   0x3   :  { %13 = vsyncpa [#allocation4 + $0x1], 0  ;;  %s1207_s12 = smov 0   ;;  %s1209_s13 = smov 0  }
   0x4   :  { %s1211_s14 = smov 0   ;;  %s1213_s15 = smov 0  }
   0x5 LB: > { %s1228_s16 = sadd.s32 4294967295, %s1176_s15   ;;  %s863_s17 = sadd.s32 4294967294, %s1176_s15   ;;  %s1176_s15 = sphi %s1213_s15, %s1747_s15   ;;  %s1172_s14 = sphi %s1211_s14, %s1746_s14   ;;  %s1168_s13 = sphi %s1209_s13, %s1745_s13   ;;  %s1164_s12 = sphi %s1207_s12, %s1744_s12  }
   0x6   : > { %s1232_s18 = sadd.s32 1, %s1176_s15   ;;  %s26_s19 = sadd.s32 1, %s1172_s14 }
   0x7   : > { %s23_s20 = ssub.s32 %s1176_s15, %s1232_s18  ;;  %p33_p0 = scmp.ne.s32.totalorder %s1172_s14, %s1168_s13 }
   0x8   : > { %p24_p1 = scmp.eq.s32.totalorder %s23_s20, 0  ;;  %p34_p2 = scmp.eq.s32.totalorder %s1176_s15, 0 }
   0x9   : > { %p39_p3 = scmp.ne.s32.totalorder %s1168_s13, %s1164_s12  ;;  %p40_p4 = scmp.eq.s32.totalorder %s1228_s16, 0 }
   0xa   : > { %s1244_s21 = scalar_select %p24_p1, %s1172_s14, %s26_s19  }
   0xb   : > { %p1246_p5 = por %p34_p2, %p33_p0  ;;  %p1250_p6 = por %p40_p4, %p39_p3 }
   0xc   : > { %p105_p7 = scmp.eq.s32.totalorder %s1228_s16, 1  ;;  %p111_p8 = scmp.eq.s32.totalorder %s863_s17, 1 }
   0xd   : > { %p1033_p10 = scmp.lt.s32.totalorder %s1176_s15, 2  ;;  %s137_s26 = sand.u32 1, %s1172_s14  }
   0xe   : > { %p1257_p11 = por %p105_p7, %p33_p0  ;;  %p1261_p12 = por %p111_p8, %p39_p3 }
   0xf   : > { %s877_s27 = sshll.u32 %s1176_s15, 11  ;;  %s866_s28 = sshll.u32 %s137_s26, 7 }
  0x10   : > { %s1738_s24 = scalar_select %p1257_p11, 1, 0 }
  0x11   : > { %s1739_s25 = scalar_select %p1261_p12, 1, 0 }
  0x12   : > { %s1270_s4 = scalar_lea.hbm %s1731_s0, %s877_s27  ;;  %s141_s5 = scalar_lea.vmem [#allocation2], %s866_s28 }
  0x13   : > { %s148_s6 = sshll.u32 %s141_s5, 4  ;;  %p1274_p13 = pnand %p1033_p10, %p1246_p5  ;;  %s1278_s6 = int_to_ptr.vmem [resolvable:$true] %s148_s6 }
  0x14   : > { %s1280_s8 = scalar_lea.sflag [#allocation3], %s137_s26  ;;  %s1080_s9 = scalar_lea.hbm %s1270_s4, 2048 }
  0x15   : > { %p1081_p0 = scmp.ne.s32.totalorder %s1270_s4, %s1080_s9  ;;  %p1082_p1 = pneg %p1274_p13 }
  0x16   : > { %s1085_s17 = scalar_lea.hbm %s1731_s0, 4096  ;;  %p1086_p4 = scmp.lt.u32.totalorder %s1270_s4, %s1731_s0 }
  0x17   : > { %p1083_p2 = pnand %p1082_p1, %p1081_p0  ;;  %p1087_p5 = scmp.lt.u32.totalorder %s1085_s17, %s1080_s9 }
  0x18   : > { %p1089_p8 = scmp.lt.u32.totalorder %s1080_s9, %s1270_s4 }
  0x19   : > { %p1084_p3 = pneg %p1083_p2  ;;  %p1088_p7 = por %p1087_p5, %p1086_p4 }
  0x1b   : > { %p1090_p10 = por %p1089_p8, %p1088_p7 }
  0x1d   : > { %p1091_p9 = pnand %p1090_p10, %p1084_p3 }
  0x1f   : > { %1094 = shalt.err (!%p1091_p9)
}
  0x20   : > { %s1095_s22 = scalar_lea.vmem %s1278_s6, 2048  ;;  %s1178_s26 = smov [#allocation2]  }
  0x21   : > { %p1096_p0 = scmp.ne.s32.totalorder %s1278_s6, %s1095_s22  ;;  %s1100_s27 = sshll.u32 %s1178_s26, 4  ;;  %s1101_s27 = int_to_ptr.vmem [resolvable:$false] %s1100_s27 }
  0x22   : > { %s1102_s28 = scalar_lea.vmem %s1101_s27, 4096  ;;  %p1103_p11 = scmp.lt.s32.totalorder %s1278_s6, %s1101_s27 }
  0x23   : > { %p1098_p2 = pnand %p1096_p0, %p1082_p1  ;;  %p1104_p4 = scmp.lt.s32.totalorder %s1102_s28, %s1095_s22 }
  0x25   : > { %p1099_p12 = pneg %p1098_p2  ;;  %p1105_p5 = por %p1104_p4, %p1103_p11 }
  0x27   : > { %p1106_p7 = pnand %p1105_p5, %p1099_p12 }
  0x29   : > { %1109 = shalt.err (!%p1106_p7)
}
  0x2a   : > { %s1179_s29 = smov 128   ;;  %s1180_s30 = smov 8  }
  0x2b   : > { %1028 = dma.hbm_to_vmem [thread:$0]  (!%p1274_p13), %s1270_s4, 2048, %s1278_s6, %s1280_s8, %s1179_s29, %s1179_s29, %s1180_s30  }
  0x2c   : > { %p869_p9 = scmp.ge.s32.totalorder %s1176_s15, 1  ;;  %p156_p1 = scmp.lt.s32.totalorder %s1176_s15, 3 }
  0x2e   : > { %p157_p3 = pnand %p869_p9, %p156_p1 }
  0x2f   : > { %s1311_s5 = sand.u32 (!%p157_p3), 1, %s1168_s13  }
  0x30   : > { %160 = sbr.rel (%p157_p3) target bundleno = 938 (0x3aa), region = 32  ;;  %s870_s9 = sshll.u32 (!%p157_p3), %s1311_s5, 7 }
  0x31   : > { %s163_s10 = scalar_lea.sflag (!%p157_p3), [#allocation3], %s1311_s5  ;;  %s1317_s11 = scalar_lea.vmem (!%p157_p3), [#allocation2], %s870_s9 }
  0x37   : > { %1155 = dma.done.wait (%p1250_p6), %s163_s10, 2048  }
  0x38   : > { %1157 = vsyncadd (%p1250_p6), %s163_s10, 4294965248  ;;  %v221_v0 = vld [vmem:[%s1317_s11] sm:$0xff]  ;;  %v222_v1 = vld [vmem:[%s1317_s11 + $0x8] sm:$0xff]  ;;  %p1741_p11 = scmp.ne.s32.totalorder %s1738_s24, 0 }
  0x39   : > { %v223_v2 = vld [vmem:[%s1317_s11 + $0x10] sm:$0xff]  ;;  %v967_v3 = vpack.c.bf16 %v222_v1, %v221_v0  ;;  %v224_v4 = vld [vmem:[%s1317_s11 + $0x18] sm:$0xff]  ;;  %v225_v6 = vld [vmem:[%s1317_s11 + $0x20] sm:$0xff] }
  0x3a   : > { %v971_v5 = vpack.c.bf16 %v224_v4, %v223_v2  ;;  %v226_v7 = vld [vmem:[%s1317_s11 + $0x28] sm:$0xff]  ;;  %v189_v9 = vld [vmem:[%s1732_s1] sm:$0xff]  ;;  %v227_v10 = vld [vmem:[%s1317_s11 + $0x30] sm:$0xff] }
  0x3b   : > { %968 = vmatprep.subr.bf16.mxu0 %v967_v3  ;;  %999 = vmatprep.subr.bf16.mxu1 %v967_v3  ;;  %v975_v8 = vpack.c.bf16 %v226_v7, %v225_v6  ;;  %v228_v11 = vld [vmem:[%s1317_s11 + $0x38] sm:$0xff]  ;;  %v197_v12 = vld [vmem:[%s1732_s1 + $0x40] sm:$0xff]  ;;  %v230_v15 = vld [vmem:[%s1317_s11 + $0x48] sm:$0xff] }
  0x3c   : > { %970 = vmatpush3.bf16.msra.mxu0 %v967_v3  ;;  %1007 = vmatpush3.bf16.msra.mxu1 %v967_v3  ;;  %v979_v13 = vpack.c.bf16 %v228_v11, %v227_v10  ;;  %v229_v14 = vld [vmem:[%s1317_s11 + $0x40] sm:$0xff]  ;;  %v231_v17 = vld [vmem:[%s1317_s11 + $0x50] sm:$0xff]  ;;  %v232_v18 = vld [vmem:[%s1317_s11 + $0x58] sm:$0xff] }
  0x3d   : > { %972 = vmatprep.subr.bf16.mxu0 %v971_v5  ;;  %1000 = vmatprep.subr.bf16.mxu1 %v971_v5  ;;  %v983_v16 = vpack.c.bf16 %v230_v15, %v229_v14  ;;  %v987_v19 = vpack.c.bf16 %v232_v18, %v231_v17  ;;  %v233_v20 = vld [vmem:[%s1317_s11 + $0x60] sm:$0xff]  ;;  %v234_v21 = vld [vmem:[%s1317_s11 + $0x68] sm:$0xff]  ;;  %v235_v23 = vld [vmem:[%s1317_s11 + $0x70] sm:$0xff] }
  0x3e   : > { %943 = vmatprep.mubr.f32.mxu0 %v189_v9  ;;  %955 = vmatprep.mubr.f32.mxu1 %v197_v12  ;;  %v991_v22 = vpack.c.bf16 %v234_v21, %v233_v20  ;;  %v236_v24 = vld [vmem:[%s1317_s11 + $0x78] sm:$0xff]  ;;  %v190_v26 = vld [vmem:[%s1732_s1 + $0x8] sm:$0xff]  ;;  %v191_v28 = vld [vmem:[%s1732_s1 + $0x10] sm:$0xff]  ;;  %s1184_s11 = smov [#allocation5]  }
  0x3f   : > { %v995_v25 = vpack.c.bf16 %v236_v24, %v235_v23  ;;  %v198_v27 = vld [vmem:[%s1732_s1 + $0x48] sm:$0xff]  ;;  %v199_v29 = vld [vmem:[%s1732_s1 + $0x50] sm:$0xff]  ;;  %v192_v30 = vld [vmem:[%s1732_s1 + $0x18] sm:$0xff] }
  0x40   : > { %974 = vmatpush3.bf16.msra.mxu0 %v971_v5  ;;  %1008 = vmatpush3.bf16.msra.mxu1 %v971_v5  ;;  %v200_v31 = vld [vmem:[%s1732_s1 + $0x58] sm:$0xff]  ;;  %v193_v32 = vld [vmem:[%s1732_s1 + $0x20] sm:$0xff]  ;;  %v194_v34 = vld [vmem:[%s1732_s1 + $0x28] sm:$0xff] }
  0x41   : > { %976 = vmatprep.subr.bf16.mxu0 %v975_v8  ;;  %1001 = vmatprep.subr.bf16.mxu1 %v975_v8  ;;  %v201_v33 = vld [vmem:[%s1732_s1 + $0x60] sm:$0xff]  ;;  %v202_v35 = vld [vmem:[%s1732_s1 + $0x68] sm:$0xff]  ;;  %v195_v36 = vld [vmem:[%s1732_s1 + $0x30] sm:$0xff] }
  0x42   : > { %v203_v37 = vld [vmem:[%s1732_s1 + $0x70] sm:$0xff]  ;;  %v196_v38 = vld [vmem:[%s1732_s1 + $0x38] sm:$0xff] }
  0x43   : > { %v204_v39 = vld [vmem:[%s1732_s1 + $0x78] sm:$0xff] }
  0x44   : > { %978 = vmatpush3.bf16.msra.mxu0 %v975_v8  ;;  %1009 = vmatpush3.bf16.msra.mxu1 %v975_v8 }
  0x45   : > { %980 = vmatprep.subr.bf16.mxu0 %v979_v13  ;;  %1002 = vmatprep.subr.bf16.mxu1 %v979_v13 }
  0x48   : > { %982 = vmatpush3.bf16.msra.mxu0 %v979_v13  ;;  %1010 = vmatpush3.bf16.msra.mxu1 %v979_v13 }
  0x49   : > { %984 = vmatprep.subr.bf16.mxu0 %v983_v16  ;;  %1003 = vmatprep.subr.bf16.mxu1 %v983_v16 }
  0x4c   : > { %986 = vmatpush3.bf16.msra.mxu0 %v983_v16  ;;  %1011 = vmatpush3.bf16.msra.mxu1 %v983_v16 }
  0x4d   : > { %988 = vmatprep.subr.bf16.mxu0 %v987_v19  ;;  %1004 = vmatprep.subr.bf16.mxu1 %v987_v19 }
  0x50   : > { %990 = vmatpush3.bf16.msra.mxu0 %v987_v19  ;;  %1012 = vmatpush3.bf16.msra.mxu1 %v987_v19 }
  0x51   : > { %992 = vmatprep.subr.bf16.mxu0 %v991_v22  ;;  %1005 = vmatprep.subr.bf16.mxu1 %v991_v22 }
  0x54   : > { %994 = vmatpush3.bf16.msra.mxu0 %v991_v22  ;;  %1013 = vmatpush3.bf16.msra.mxu1 %v991_v22 }
  0x55   : > { %996 = vmatprep.subr.bf16.mxu0 %v995_v25  ;;  %1006 = vmatprep.subr.bf16.mxu1 %v995_v25 }
  0x58   : > { %998 = vmatpush3.bf16.msra.mxu0 %v995_v25  ;;  %1014 = vmatpush3.bf16.msra.mxu1 %v995_v25 }
  0x5b   : > { %944 = vmatmul.mubr.f32.vlgmr.msra.gmra.mrb[0].mxu0 %v190_v26  ;;  %956 = vmatmul.mubr.f32.vlgmr.msra.gmra.mrb[0].mxu1 %v198_v27 }
  0x5c   : > { %946 = vmatprep.mubr.f32.mxu0 %v191_v28  ;;  %958 = vmatprep.mubr.f32.mxu1 %v199_v29 }
  0x5f   : > { %947 = vmatmul.mubr.f32.gmra.mrb[2].mxu0 %v192_v30  ;;  %959 = vmatmul.mubr.f32.gmra.mrb[2].mxu1 %v200_v31 }
  0x60   : > { %949 = vmatprep.mubr.f32.mxu0 %v193_v32  ;;  %961 = vmatprep.mubr.f32.mxu1 %v201_v33 }
  0x63   : > { %950 = vmatmul.mubr.f32.gmra.mrb[4].mxu0 %v194_v34  ;;  %962 = vmatmul.mubr.f32.gmra.mrb[4].mxu1 %v202_v35 }
  0x64   : > { %952 = vmatprep.mubr.f32.mxu0 %v195_v36  ;;  %964 = vmatprep.mubr.f32.mxu1 %v203_v37 }
  0x67   : > { %953 = vmatmul.mubr.f32.gmra.mrb[6].mxu0 %v196_v38  ;;  %965 = vmatmul.mubr.f32.gmra.mrb[6].mxu1 %v204_v39 }
 0x12e   : > { %v1387_v40 = vpop.f32.mrb[0].mxu0  ;;  %v1389_v41 = vpop.f32.mrb[0].mxu1 }
 0x12f   : > { %v408_v42 = vmul.f32 %v1387_v40, %v1387_v40  ;;  %v1393_v43 = vpop.f32.mrb[1].mxu0  ;;  %v1395_v44 = vpop.f32.mrb[1].mxu1  ;;  %v416_v16 = vmul.f32 %v1389_v41, %v1389_v41 }
 0x130   : > { %v382_v45 = vadd.f32 %v1387_v40, %v1393_v43  ;;  %v407_v46 = vmul.f32 %v1393_v43, %v1393_v43  ;;  %v415_v13 = vmul.f32 %v1395_v44, %v1395_v44 }
 0x132   : > { %v423_v47 = vadd.f32 %v408_v42, %v407_v46  ;;  %v1401_v48 = vpop.f32.mrb[2].mxu0  ;;  %v1403_v49 = vpop.f32.mrb[2].mxu1 }
 0x133   : > { %v1405_v50 = vpop.f32.mrb[3].mxu0  ;;  %v1407_v51 = vpop.f32.mrb[3].mxu1  ;;  %v410_v54 = vmul.f32 %v1401_v48, %v1401_v48  ;;  %v418_v22 = vmul.f32 %v1403_v49, %v1403_v49 }
 0x134   : > { %v383_v52 = vadd.f32 %v382_v45, %v1405_v50  ;;  %v409_v53 = vmul.f32 %v1405_v50, %v1405_v50  ;;  %v417_v19 = vmul.f32 %v1407_v51, %v1407_v51 }
 0x136   : > { %v424_v55 = vadd.f32 %v423_v47, %v409_v53  ;;  %v1414_v56 = vpop.f32.mrb[4].mxu0  ;;  %v384_v57 = vadd.f32 %v1401_v48, %v383_v52  ;;  %v1417_v58 = vpop.f32.mrb[4].mxu1 }
 0x137   : > { %v1419_v59 = vpop.f32.mrb[5].mxu0  ;;  %v1421_v60 = vpop.f32.mrb[5].mxu1  ;;  %v412_v0 = vmul.f32 %v1414_v56, %v1414_v56  ;;  %v420_v28 = vmul.f32 %v1417_v58, %v1417_v58 }
 0x138   : > { %v385_v61 = vadd.f32 %v384_v57, %v1419_v59  ;;  %v411_v62 = vmul.f32 %v1419_v59, %v1419_v59  ;;  %v425_v63 = vadd.f32 %v424_v55, %v410_v54  ;;  %v419_v25 = vmul.f32 %v1421_v60, %v1421_v60 }
 0x139   : > { %v1181_v54 = vmov 0  }
 0x13a   : > { %v426_v1 = vadd.f32 %v425_v63, %v411_v62  ;;  %v1428_v2 = vpop.f32.mrb[6].mxu0  ;;  %v386_v3 = vadd.f32 %v1414_v56, %v385_v61  ;;  %v1431_v4 = vpop.f32.mrb[6].mxu1  ;;  %1075 = vset.pattern.permute.xlu0 %v1181_v54  ;;  %1074 = vset.pattern.permute.xlu1 %v1181_v54 }
 0x13b   : > { %v1433_v5 = vpop.f32.mrb[7].mxu0  ;;  %v1435_v6 = vpop.f32.mrb[7].mxu1  ;;  %v414_v10 = vmul.f32 %v1428_v2, %v1428_v2  ;;  %v422_v35 = vmul.f32 %v1431_v4, %v1431_v4 }
 0x13c   : > { %v387_v7 = vadd.f32 %v386_v3, %v1433_v5  ;;  %v413_v8 = vmul.f32 %v1433_v5, %v1433_v5  ;;  %v427_v9 = vadd.f32 %v426_v1, %v412_v0  ;;  %v421_v31 = vmul.f32 %v1435_v6, %v1435_v6 }
 0x13e   : > { %v388_v11 = vadd.f32 %v1428_v2, %v387_v7  ;;  %v428_v12 = vadd.f32 %v427_v9, %v413_v8  ;;  %v1470_v7 = vld [vmem:[%s1733_s2 + $0x8] sm:$0xff]  ;;  %v1475_v8 = vld [vmem:[%s1733_s2] sm:$0xff]  ;;  %v1480_v9 = vld [vmem:[%s1733_s2 + $0x10] sm:$0xff] }
 0x140   : > { %v429_v14 = vadd.f32 %v428_v12, %v414_v10  ;;  %v389_v15 = vadd.f32 %v388_v11, %v1395_v44 }
 0x142   : > { %v430_v17 = vadd.f32 %v429_v14, %v415_v13  ;;  %v390_v18 = vadd.f32 %v1389_v41, %v389_v15  ;;  %v1493_v14 = vld [vmem:[%s1733_s2 + $0x48] sm:$0xff] }
 0x144   : > { %v391_v20 = vadd.f32 %v390_v18, %v1407_v51  ;;  %v431_v21 = vadd.f32 %v430_v17, %v416_v16  ;;  %v1505_v18 = vld [vmem:[%s1733_s2 + $0x58] sm:$0xff] }
 0x146   : > { %v432_v23 = vadd.f32 %v431_v21, %v417_v19  ;;  %v392_v24 = vadd.f32 %v1403_v49, %v391_v20 }
 0x148   : > { %v393_v26 = vadd.f32 %v392_v24, %v1421_v60  ;;  %v433_v27 = vadd.f32 %v432_v23, %v418_v22  ;;  %v1516_v22 = vld [vmem:[%s1733_s2 + $0x68] sm:$0xff]  ;;  %v1521_v23 = vld [vmem:[%s1733_s2 + $0x18] sm:$0xff] }
 0x14a   : > { %v434_v29 = vadd.f32 %v433_v27, %v419_v25  ;;  %v394_v30 = vadd.f32 %v1417_v58, %v393_v26 }
 0x14c   : > { %v395_v32 = vadd.f32 %v394_v30, %v1435_v6  ;;  %v435_v33 = vadd.f32 %v434_v29, %v420_v28  ;;  %v1534_v28 = vld [vmem:[%s1733_s2 + $0x78] sm:$0xff]  ;;  %v1539_v29 = vld [vmem:[%s1733_s2 + $0x20] sm:$0xff] }
 0x14e   : > { %v396_v34 = vadd.f32 %v1431_v4, %v395_v32  ;;  %v436_v36 = vadd.f32 %v435_v33, %v421_v31 }
 0x150   : > { %397 = vadd.xlane.f32.xlu0 %v396_v34  ;;  %v437_v37 = vadd.f32 %v436_v36, %v422_v35  ;;  %v1552_v34 = vld [vmem:[%s1733_s2 + $0x28] sm:$0xff] }
 0x154   : > { %438 = vadd.xlane.f32.xlu0 %v437_v37 }
 0x1dd   : > { %v398_v38 = vpop.xlane.xlu0 %397 }
 0x1de   : > { %v399_v39 = vrot.slane %v398_v38, 4 }
 0x1e0   : > { %v400_v42 = vadd.f32 %v399_v39, %v398_v38  ;;  %v1563_v38 = vld [vmem:[%s1733_s2 + $0x30] sm:$0xff] }
 0x1e1   : > { %v439_v45 = vpop.xlane.xlu0 %438 }
 0x1e2   : > { %v401_v46 = vrot.slane %v400_v42, 2  ;;  %v440_v47 = vrot.slane %v439_v45, 4 }
 0x1e4   : > { %v441_v52 = vadd.f32 %v440_v47, %v439_v45  ;;  %v402_v53 = vadd.f32 %v401_v46, %v400_v42  ;;  %v1573_v45 = vld [vmem:[%s1733_s2 + $0x38] sm:$0xff] }
 0x1e6   : > { %v442_v55 = vrot.slane %v441_v52, 2  ;;  %v403_v57 = vrot.slane %v402_v53, 1 }
 0x1e8   : > { %v404_v61 = vadd.f32 %v403_v57, %v402_v53  ;;  %v443_v62 = vadd.f32 %v442_v55, %v441_v52  ;;  %v1582_v52 = vld [vmem:[%s1733_s2 + $0x40] sm:$0xff]  ;;  %v1591_v55 = vld [vmem:[%s1733_s2 + $0x50] sm:$0xff] }
 0x1ea   : > { %1015 = vpush %v404_v61  ;;  %v444_v63 = vrot.slane %v443_v62, 1 }
 0x1ec   : > { %v445_v0 = vadd.f32 %v444_v63, %v443_v62  ;;  %v1600_v62 = vld [vmem:[%s1733_s2 + $0x60] sm:$0xff] }
 0x1ee   : > { %1017 = vpush %v445_v0 }
 0x21b   : > { %s1016_s23 = spop %1015 }
 0x21c   : > { %s406_s4 = smul.f32 0.001953125, %s1016_s23  ;;  %s1114_s23 = sshll.u32 %s1184_s11, 4  ;;  %s1115_s23 = int_to_ptr.vmem [resolvable:$false] %s1114_s23 }
 0x21e   : > { %s448_s6 = smul.f32 %s406_s4, %s406_s4  ;;  %v1495_v15 = vstv %s406_s4 }
 0x21f   : > { %s1018_s7 = spop %1017 }
 0x220   : > { %s447_s8 = smul.f32 0.001953125, %s1018_s7  ;;  %s1182_s7 = smov 1  }
 0x222   : > { %s449_s17 = ssub.f32 %s447_s8, %s448_s6  ;;  %s1116_s6 = scalar_lea.vmem %s1115_s23, 4096 }
 0x224   : > { %s450_s19 = sadd.f32 1e-05, %s449_s17 }
 0x226   : > { %v451_v1 = vstv %s450_s19 }
 0x227   : > { %1078 = vrsqrt.f32 %v451_v1  ;;  %v1609_v1 = vld [vmem:[%s1733_s2 + $0x70] sm:$0xff] }
 0x231   : > { %v1079_v3 = vpop.eup %1078 }
 0x232   : > { %1019 = vpush %v1079_v3 }
 0x263   : > { %s1020_s30 = spop %1019 }
 0x264   : > { %v1482_v10 = vstv %s1020_s30 }
 0x265   : > { %v456_v11 = vmul.f32 %v1482_v10, %v1470_v7  ;;  %v455_v12 = vmul.f32 %v1482_v10, %v1475_v8  ;;  %v457_v13 = vmul.f32 %v1482_v10, %v1480_v9  ;;  %v1500_v17 = vmul.f32 %v1482_v10, %v1493_v14 }
 0x266   : > { %v466_v21 = vmul.f32 %v1482_v10, %v1505_v18  ;;  %v468_v26 = vmul.f32 %v1482_v10, %v1516_v22  ;;  %v458_v27 = vmul.f32 %v1482_v10, %v1521_v23  ;;  %v470_v32 = vmul.f32 %v1482_v10, %v1534_v28 }
 0x267   : > { %575 = vperm.xlu0 %1075, %v456_v11   ;;  %570 = vperm.xlu1 %1074, %v455_v12   ;;  %v474_v16 = vmul.f32 %v1495_v15, %v457_v13  ;;  %v472_v19 = vmul.f32 %v1495_v15, %v455_v12  ;;  %v481_v20 = vmul.f32 %v1495_v15, %v1500_v17 }
 0x268   : > { %v483_v24 = vmul.f32 %v1495_v15, %v466_v21  ;;  %v473_v25 = vmul.f32 %v1495_v15, %v456_v11  ;;  %v485_v30 = vmul.f32 %v1495_v15, %v468_v26  ;;  %v475_v31 = vmul.f32 %v1495_v15, %v458_v27 }
 0x269   : > { %v459_v33 = vmul.f32 %v1482_v10, %v1539_v29  ;;  %v487_v35 = vmul.f32 %v1495_v15, %v470_v32  ;;  %v460_v37 = vmul.f32 %v1482_v10, %v1552_v34  ;;  %v461_v42 = vmul.f32 %v1482_v10, %v1563_v38 }
 0x26a   : > { %v462_v47 = vmul.f32 %v1482_v10, %v1573_v45  ;;  %v463_v53 = vmul.f32 %v1482_v10, %v1582_v52  ;;  %v465_v57 = vmul.f32 %v1482_v10, %v1591_v55  ;;  %v467_v63 = vmul.f32 %v1482_v10, %v1600_v62 }
 0x26b   : > { %508 = vrot.lane.b32.xlu0 %v474_v16, %s1182_s7  ;;  %580 = vperm.xlu1 %1074, %v457_v13   ;;  %v476_v36 = vmul.f32 %v1495_v15, %v459_v33  ;;  %v477_v39 = vmul.f32 %v1495_v15, %v460_v37  ;;  %v478_v46 = vmul.f32 %v1495_v15, %v461_v42  ;;  %v1183_v13 = vmov 1  }
 0x26c   : > { %v479_v54 = vmul.f32 %v1495_v15, %v462_v47  ;;  %v480_v61 = vmul.f32 %v1495_v15, %v463_v53  ;;  %v482_v0 = vmul.f32 %v1495_v15, %v465_v57  ;;  %v469_v3 = vmul.f32 %v1482_v10, %v1609_v1 }
 0x26d   : > { %v484_v11 = vmul.f32 %v1495_v15, %v467_v63 }
 0x26e   : > { %v486_v12 = vmul.f32 %v1495_v15, %v469_v3 }
 0x26f   : > { %522 = vrot.lane.b32.xlu0 %v481_v20, %s1182_s7  ;;  %504 = vrot.lane.b32.xlu1 %v472_v19, %s1182_s7 }
 0x273   : > { %526 = vrot.lane.b32.xlu0 %v483_v24, %s1182_s7  ;;  %506 = vrot.lane.b32.xlu1 %v473_v25, %s1182_s7 }
 0x277   : > { %530 = vrot.lane.b32.xlu0 %v485_v30, %s1182_s7  ;;  %510 = vrot.lane.b32.xlu1 %v475_v31, %s1182_s7 }
 0x27b   : > { %534 = vrot.lane.b32.xlu0 %v487_v35, %s1182_s7  ;;  %512 = vrot.lane.b32.xlu1 %v476_v36, %s1182_s7 }
 0x27f   : > { %590 = vperm.xlu0 %1075, %v459_v33   ;;  %514 = vrot.lane.b32.xlu1 %v477_v39, %s1182_s7 }
 0x283   : > { %600 = vperm.xlu0 %1075, %v461_v42   ;;  %516 = vrot.lane.b32.xlu1 %v478_v46, %s1182_s7 }
 0x287   : > { %610 = vperm.xlu0 %1075, %v463_v53   ;;  %518 = vrot.lane.b32.xlu1 %v479_v54, %s1182_s7 }
 0x28b   : > { %620 = vperm.xlu0 %1075, %v465_v57   ;;  %520 = vrot.lane.b32.xlu1 %v480_v61, %s1182_s7 }
 0x28f   : > { %630 = vperm.xlu0 %1075, %v467_v63   ;;  %524 = vrot.lane.b32.xlu1 %v482_v0, %s1182_s7 }
 0x293   : > { %640 = vperm.xlu0 %1075, %v469_v3   ;;  %528 = vrot.lane.b32.xlu1 %v484_v11, %s1182_s7 }
 0x297   : > { %532 = vrot.lane.b32.xlu1 %v486_v12, %s1182_s7  ;;  %1076 = vset.pattern.permute.xlu0 %v1183_v13  ;;  %s1647_s7 = scalar_lea.vmem [#allocation5], %s870_s9  ;;  %s878_s9 = sshll.u32 %s1228_s16, 11 }
 0x298   : > { %s790_s27 = sshll.u32 %s1647_s7, 4  ;;  %s1683_s30 = scalar_lea.hbm %s1734_s3, %s878_s9  ;;  %s1685_s27 = int_to_ptr.vmem [resolvable:$true] %s790_s27 }
 0x299   : > { %s777_s16 = scalar_lea.sflag [#allocation4], %s1311_s5  ;;  %s1110_s10 = scalar_lea.vmem %s1685_s27, 2048 }
 0x29a   : > { %p1111_p6 = scmp.ne.s32.totalorder %s1685_s27, %s1110_s10  ;;  %p1117_p8 = scmp.lt.s32.totalorder %s1685_s27, %s1115_s23 }
 0x29b   : > { %585 = vperm.xlu1 %1074, %v458_v27   ;;  %p1118_p10 = scmp.lt.s32.totalorder %s1116_s6, %s1110_s10 }
 0x29c   : > { %p1112_p12 = pnand %p1111_p6, %p1741_p11 }
 0x29d   : > { %p1119_p0 = por %p1118_p10, %p1117_p8 }
 0x29e   : > { %p1113_p13 = pneg %p1112_p12 }
 0x29f   : > { %595 = vperm.xlu1 %1074, %v460_v37  }
 0x2a0   : > { %p1120_p2 = pnand %p1119_p0, %p1113_p13 }
 0x2a3   : > { %605 = vperm.xlu1 %1074, %v462_v47  }
 0x2a7   : > { %615 = vperm.xlu1 %1074, %v1500_v17  }
 0x2ab   : > { %625 = vperm.xlu1 %1074, %v466_v21  }
 0x2af   : > { %635 = vperm.xlu1 %1074, %v468_v26  }
 0x2b3   : > { %645 = vperm.xlu1 %1074, %v470_v32  }
 0x2b7   : > { %1077 = vset.pattern.permute.xlu1 %v1183_v13 }
 0x2e6   : > { %v576_v10 = vpop.permute.xlu0 %575  ;;  %v571_v16 = vpop.permute.xlu1 %570 }
 0x2e7   : > { %v1620_v19 = vmul.f32 %v1387_v40, %v576_v10  ;;  %v1623_v15 = vmul.f32 %v571_v16, %v1393_v43 }
 0x2ea   : > { %v581_v20 = vpop.permute.xlu1 %580  ;;  %v509_v26 = vpop.permute.xlu0 %508 }
 0x2eb   : > { %v1626_v24 = vmul.f32 %v581_v20, %v1405_v50  ;;  %v554_v40 = vsub.f32 %v1480_v9, %v509_v26 }
 0x2ee   : > { %v505_v25 = vpop.permute.xlu1 %504  ;;  %v523_v33 = vpop.permute.xlu0 %522 }
 0x2ef   : > { %v552_v27 = vsub.f32 %v1475_v8, %v505_v25  ;;  %v561_v39 = vsub.f32 %v1493_v14, %v523_v33 }
 0x2f1   : > { %666 = vperm.xlu0 %1076, %v552_v27  }
 0x2f2   : > { %v507_v17 = vpop.permute.xlu1 %506  ;;  %v527_v37 = vpop.permute.xlu0 %526 }
 0x2f3   : > { %v553_v21 = vsub.f32 %v1470_v7, %v507_v17  ;;  %v563_v46 = vsub.f32 %v1505_v18, %v527_v37 }
 0x2f5   : > { %671 = vperm.xlu1 %1077, %v553_v21  }
 0x2f6   : > { %v511_v30 = vpop.permute.xlu1 %510  ;;  %v531_v42 = vpop.permute.xlu0 %530 }
 0x2f7   : > { %v555_v31 = vsub.f32 %v1521_v23, %v511_v30 }
 0x2f9   : > { %676 = vperm.xlu1 %1077, %v554_v40   ;;  %681 = vperm.xlu0 %1076, %v555_v31  }
 0x2fa   : > { %v513_v43 = vpop.permute.xlu1 %512  ;;  %v535_v54 = vpop.permute.xlu0 %534 }
 0x2fb   : > { %v556_v50 = vsub.f32 %v1539_v29, %v513_v43 }
 0x2fd   : > { %686 = vperm.xlu1 %1077, %v556_v50  }
 0x2fe   : > { %v515_v32 = vpop.permute.xlu1 %514 }
 0x2ff   : > { %v557_v8 = vsub.f32 %v1552_v34, %v515_v32 }
 0x301   : > { %691 = vperm.xlu0 %1076, %v557_v8  }
 0x302   : > { %v517_v35 = vpop.permute.xlu1 %516 }
 0x303   : > { %v558_v7 = vsub.f32 %v1563_v38, %v517_v35 }
 0x305   : > { %696 = vperm.xlu1 %1077, %v558_v7  }
 0x306   : > { %v519_v36 = vpop.permute.xlu1 %518 }
 0x307   : > { %v559_v9 = vsub.f32 %v1573_v45, %v519_v36  ;;  %v565_v45 = vsub.f32 %v1516_v22, %v531_v42 }
 0x309   : > { %701 = vperm.xlu0 %1076, %v559_v9  }
 0x30a   : > { %v521_v23 = vpop.permute.xlu1 %520 }
 0x30b   : > { %v560_v29 = vsub.f32 %v1582_v52, %v521_v23  ;;  %v567_v52 = vsub.f32 %v1534_v28, %v535_v54 }
 0x30d   : > { %711 = vperm.xlu0 %1076, %v561_v39   ;;  %706 = vperm.xlu1 %1077, %v560_v29  }
 0x30e   : > { %v525_v34 = vpop.permute.xlu1 %524 }
 0x30f   : > { %v562_v47 = vsub.f32 %v1591_v55, %v525_v34  ;;  %v591_v55 = vpop.permute.xlu0 %590 }
 0x310   : > { %v652_v30 = vmul.f32 %v591_v55, %v1419_v59 }
 0x311   : > { %721 = vperm.xlu0 %1076, %v563_v46   ;;  %716 = vperm.xlu1 %1077, %v562_v47  }
 0x312   : > { %v529_v38 = vpop.permute.xlu1 %528 }
 0x313   : > { %v564_v53 = vsub.f32 %v1600_v62, %v529_v38  ;;  %v601_v63 = vpop.permute.xlu0 %600 }
 0x314   : > { %v654_v50 = vmul.f32 %v601_v63, %v1433_v5 }
 0x315   : > { %731 = vperm.xlu0 %1076, %v565_v45   ;;  %726 = vperm.xlu1 %1077, %v564_v53  }
 0x316   : > { %v533_v14 = vpop.permute.xlu1 %532 }
 0x317   : > { %v566_v57 = vsub.f32 %v1609_v1, %v533_v14  ;;  %v611_v3 = vpop.permute.xlu0 %610 }
 0x318   : > { %v656_v35 = vmul.f32 %v611_v3, %v1395_v44 }
 0x319   : > { %741 = vperm.xlu0 %1076, %v567_v52   ;;  %736 = vperm.xlu1 %1077, %v566_v57  }
 0x31a   : > { %v586_v18 = vpop.permute.xlu1 %585 }
 0x31b   : > { %v621_v11 = vpop.permute.xlu0 %620  ;;  %v651_v27 = vmul.f32 %v1401_v48, %v586_v18 }
 0x31c   : > { %v658_v37 = vmul.f32 %v621_v11, %v1407_v51 }
 0x31e   : > { %v596_v61 = vpop.permute.xlu1 %595 }
 0x31f   : > { %v631_v12 = vpop.permute.xlu0 %630  ;;  %v653_v43 = vmul.f32 %v1414_v56, %v596_v61 }
 0x320   : > { %v660_v29 = vmul.f32 %v631_v12, %v1421_v60 }
 0x322   : > { %v606_v0 = vpop.permute.xlu1 %605 }
 0x323   : > { %v641_v10 = vpop.permute.xlu0 %640 }
 0x324   : > { %v662_v47 = vmul.f32 %v641_v10, %v1435_v6 }
 0x326   : > { %v616_v22 = vpop.permute.xlu1 %615 }
 0x327   : > { %v657_v7 = vmul.f32 %v1389_v41, %v616_v22 }
 0x32a   : > { %v626_v62 = vpop.permute.xlu1 %625 }
 0x32b   : > { %v659_v23 = vmul.f32 %v1403_v49, %v626_v62 }
 0x32e   : > { %v636_v13 = vpop.permute.xlu1 %635 }
 0x32f   : > { %v661_v42 = vmul.f32 %v1417_v58, %v636_v13 }
 0x332   : > { %v646_v16 = vpop.permute.xlu1 %645 }
 0x333   : > { %v663_v38 = vmul.f32 %v1431_v4, %v646_v16 }
 0x370   : > { %v667_v20 = vpop.permute.xlu0 %666 }
 0x371   : > { %v744_v28 = vadd.f32 %v667_v20, %v1623_v15 }
 0x373   : > { %760 = vst [vmem:[%s1647_s7] sm:$0xff] %v744_v28 }
 0x374   : > { %v672_v1 = vpop.permute.xlu1 %671 }
 0x375   : > { %v745_v25 = vadd.f32 %v672_v1, %v1620_v19 }
 0x377   : > { %761 = vst [vmem:[%s1647_s7 + $0x8] sm:$0xff] %v745_v25 }
 0x378   : > { %v682_v17 = vpop.permute.xlu0 %681  ;;  %v677_v21 = vpop.permute.xlu1 %676 }
 0x379   : > { %v747_v26 = vadd.f32 %v682_v17, %v651_v27  ;;  %v746_v15 = vadd.f32 %v677_v21, %v1626_v24  ;;  %v655_v24 = vmul.f32 %v1428_v2, %v606_v0 }
 0x37b   : > { %763 = vst [vmem:[%s1647_s7 + $0x18] sm:$0xff] %v747_v26  ;;  %762 = vst [vmem:[%s1647_s7 + $0x10] sm:$0xff] %v746_v15 }
 0x37c   : > { %v687_v40 = vpop.permute.xlu1 %686 }
 0x37d   : > { %v748_v31 = vadd.f32 %v687_v40, %v652_v30 }
 0x37f   : > { %764 = vst [vmem:[%s1647_s7 + $0x20] sm:$0xff] %v748_v31 }
 0x380   : > { %v692_v19 = vpop.permute.xlu0 %691 }
 0x381   : > { %v749_v48 = vadd.f32 %v692_v19, %v653_v43 }
 0x383   : > { %765 = vst [vmem:[%s1647_s7 + $0x28] sm:$0xff] %v749_v48 }
 0x384   : > { %v697_v32 = vpop.permute.xlu1 %696 }
 0x385   : > { %v750_v8 = vadd.f32 %v697_v32, %v654_v50 }
 0x387   : > { %766 = vst [vmem:[%s1647_s7 + $0x30] sm:$0xff] %v750_v8 }
 0x388   : > { %v702_v59 = vpop.permute.xlu0 %701 }
 0x389   : > { %v751_v33 = vadd.f32 %v702_v59, %v655_v24 }
 0x38b   : > { %767 = vst [vmem:[%s1647_s7 + $0x38] sm:$0xff] %v751_v33 }
 0x38c   : > { %v712_v56 = vpop.permute.xlu0 %711  ;;  %v707_v36 = vpop.permute.xlu1 %706 }
 0x38d   : > { %v753_v5 = vadd.f32 %v712_v56, %v657_v7  ;;  %v752_v9 = vadd.f32 %v707_v36, %v656_v35 }
 0x38f   : > { %769 = vst [vmem:[%s1647_s7 + $0x48] sm:$0xff] %v753_v5  ;;  %768 = vst [vmem:[%s1647_s7 + $0x40] sm:$0xff] %v752_v9 }
 0x390   : > { %v722_v2 = vpop.permute.xlu0 %721  ;;  %v717_v44 = vpop.permute.xlu1 %716 }
 0x391   : > { %v755_v41 = vadd.f32 %v722_v2, %v659_v23  ;;  %v754_v39 = vadd.f32 %v717_v44, %v658_v37 }
 0x393   : > { %771 = vst [vmem:[%s1647_s7 + $0x58] sm:$0xff] %v755_v41  ;;  %770 = vst [vmem:[%s1647_s7 + $0x50] sm:$0xff] %v754_v39 }
 0x394   : > { %v732_v34 = vpop.permute.xlu0 %731  ;;  %v727_v51 = vpop.permute.xlu1 %726 }
 0x395   : > { %v757_v49 = vadd.f32 %v732_v34, %v661_v42  ;;  %v756_v46 = vadd.f32 %v727_v51, %v660_v29 }
 0x397   : > { %773 = vst [vmem:[%s1647_s7 + $0x68] sm:$0xff] %v757_v49  ;;  %772 = vst [vmem:[%s1647_s7 + $0x60] sm:$0xff] %v756_v46 }
 0x398   : > { %v742_v60 = vpop.permute.xlu0 %741  ;;  %v737_v58 = vpop.permute.xlu1 %736 }
 0x399   : > { %v759_v45 = vadd.f32 %v742_v60, %v663_v38  ;;  %v758_v53 = vadd.f32 %v737_v58, %v662_v47 }
 0x39b   : > { %775 = vst [vmem:[%s1647_s7 + $0x78] sm:$0xff] %v759_v45  ;;  %774 = vst [vmem:[%s1647_s7 + $0x70] sm:$0xff] %v758_v53 }
 0x39c   : > { %1123 = shalt.err (!%p1120_p2)
}
 0x39d   : > { %s1124_s4 = scalar_lea.hbm %s1683_s30, 2048  ;;  %s1128_s19 = scalar_lea.hbm %s1734_s3, 4096 }
 0x39e   : > { %p1125_p4 = scmp.ne.s32.totalorder %s1683_s30, %s1124_s4  ;;  %p1129_p9 = scmp.lt.u32.totalorder %s1683_s30, %s1734_s3 }
 0x39f   : > { %p1130_p1 = scmp.lt.u32.totalorder %s1128_s19, %s1124_s4  ;;  %p1132_p6 = scmp.lt.u32.totalorder %s1124_s4, %s1683_s30 }
 0x3a0   : > { %p1126_p5 = pnand %p1125_p4, %p1741_p11 }
 0x3a1   : > { %p1131_p3 = por %p1130_p1, %p1129_p9 }
 0x3a2   : > { %p1127_p7 = pneg %p1126_p5 }
 0x3a3   : > { %p1133_p12 = por %p1132_p6, %p1131_p3 }
 0x3a5   : > { %p1134_p13 = pnand %p1133_p12, %p1127_p7 }
 0x3a7   : > { %1137 = shalt.err (!%p1134_p13)
}
 0x3a8   : > { %s1185_s26 = smov 128   ;;  %s1186_s7 = smov 8  }
 0x3a9   : > { %1023 = dma.vmem_to_hbm [thread:$0]  (%p1741_p11), %s1685_s27, 2048, %s1683_s30, %s777_s16, %s1185_s26, %s1185_s26, %s1186_s7  }
 0x3aa PF: > { %s805_s9 = sand.u32 1, %s1164_s12   ;;  %p1742_p8 = scmp.ne.s32.totalorder %s1739_s25, 0 }
 0x3ab   : > { %p1743_p10 = scmp.ge.s32.totalorder %s1176_s15, 2  ;;  %s806_s28 = scalar_lea.sflag [#allocation4], %s805_s9 }
 0x3ad   : > { %p1030_p0 = pnand %p1743_p10, %p1742_p8 }
 0x3af   : > { %1159 = dma.done.wait (!%p1030_p0), %s806_s28, 2048  }
 0x3b0   : > { %1161 = vsyncadd (!%p1030_p0), %s806_s28, 4294965248  ;;  %p16_p2 = scmp.ge.s32.totalorder %s1232_s18, 4   ;;  %s1744_s12 = smov %s1168_s13 }
 0x3b1   : > { %s1745_s13 = smov %s1172_s14  ;;  %s1746_s14 = smov %s1244_s21 }
 0x3b2   : > { %s1747_s15 = smov %s1232_s18  ;;  %18 = sbr.rel (!%p16_p2) target bundleno = 5 (0x5), region = 77 }
 0x3b9   :  { %811 = vsyncpa [#allocation3], 1 }
 0x3ba   :  { %813 = vsyncpa [#allocation3 + $0x1], 1 }
 0x3bb   :  { %814 = vsyncpa [#allocation4], 1 }
 0x3bc   :  { %816 = vsyncpa [#allocation4 + $0x1], 1 }

</bundles_post_ra>
